<compile_context>
chip_gen: v7x
topology: tpu7x:2x2x1
jax: 0.10.0
libtpu: 0.0.40
codegen_flags: <defaults>
</compile_context>

<pallas_src>
import functools

import jax
import jax.numpy as jnp
from jax import lax
from jax.experimental import pallas as pl
from jax.experimental.pallas import tpu as pltpu


def _sepconv_row_kernel(x_ref, wdw_ref, wpw_ref, scale_ref, bias_ref, o_ref,
                        *, kh, kw, stride, w_out):
    """Computes one output row (W_out, C_out) of SepConv for one image."""
    h = pl.program_id(1)
    c_in = x_ref.shape[-1]

    # Rows of the zero-padded input needed for output row h. ReLU is applied
    # here; the zero padding is unaffected (relu(0) == 0).
    win = x_ref[0, pl.ds(h * stride, kh), :, :]              # (KH, Wp, C_in)
    win = jnp.maximum(win, 0.0).astype(jnp.float32)

    wdw = wdw_ref[...].astype(jnp.float32)                   # (KH*KW, C_in)

    # Depthwise conv (VPU): shift-and-accumulate over the KH x KW taps.
    acc = jnp.zeros((w_out, c_in), jnp.float32)
    for dy in range(kh):
        row = win[dy]                                        # (Wp, C_in)
        for dx in range(kw):
            if stride == 1:
                seg = row[dx:dx + w_out, :]
            else:
                seg = lax.slice(row, (dx, 0),
                                (dx + (w_out - 1) * stride + 1, c_in),
                                (stride, 1))
            acc = acc + seg * wdw[dy * kw + dx]

    # Pointwise 1x1 conv (MXU): (W_out, C_in) @ (C_in, C_out).
    pw = jnp.dot(acc, wpw_ref[...].astype(jnp.float32),
                 preferred_element_type=jnp.float32)          # (W_out, C_out)

    # BatchNorm (eval) folded into per-channel scale & bias.
    out = pw * scale_ref[...] + bias_ref[...]                 # (W_out, C_out)
    o_ref[0, 0, :, :] = out.astype(o_ref.dtype)


def sep_conv(x, w_dw, w_pw, gamma, beta, running_mean, running_var,
             *, stride=1, padding=1, eps=1e-5):
    """SepConv forward.

    x:    (N, C_in, H, W)   NCHW (PyTorch layout)
    w_dw: (KH, KW, C_in)    depthwise weights (torch weight[c, 0, kh, kw])
    w_pw: (C_in, C_out)     pointwise 1x1 weights (torch weight[o, c, 0, 0].T)
    gamma/beta/running_mean/running_var: (C_out,) BatchNorm parameters.
    """
    n, c_in, hh, ww = x.shape
    kh, kw, _ = w_dw.shape
    c_out = w_pw.shape[1]
    h_out = (hh + 2 * padding - kh) // stride + 1
    w_out = (ww + 2 * padding - kw) // stride + 1

    # NHWC internally (channels in lanes); zero-pad spatially for the conv.
    x_nhwc = jnp.transpose(x, (0, 2, 3, 1))
    x_pad = jnp.pad(x_nhwc,
                    ((0, 0), (padding, padding), (padding, padding), (0, 0)))
    hp, wp = hh + 2 * padding, ww + 2 * padding

    # Fold eval-mode BatchNorm into a per-channel affine.
    inv_std = gamma / jnp.sqrt(running_var + eps)
    scale = inv_std.reshape(1, c_out).astype(jnp.float32)
    bias = (beta - running_mean * inv_std).reshape(1, c_out).astype(jnp.float32)
    wdw2 = w_dw.reshape(kh * kw, c_in)

    kernel = functools.partial(_sepconv_row_kernel, kh=kh, kw=kw,
                               stride=stride, w_out=w_out)

    flops = n * h_out * w_out * (2 * kh * kw * c_in + 2 * c_in * c_out + 2 * c_out)
    bytes_accessed = 4 * (x_pad.size + wdw2.size + w_pw.size + 2 * c_out
                          + n * h_out * w_out * c_out)

    out_nhwc = pl.pallas_call(
        kernel,
        out_shape=jax.ShapeDtypeStruct((n, h_out, w_out, c_out), x.dtype),
        grid_spec=pltpu.PrefetchScalarGridSpec(
            num_scalar_prefetch=0,
            grid=(n, h_out),
            in_specs=[
                pl.BlockSpec((1, hp, wp, c_in), lambda b, h: (b, 0, 0, 0)),
                pl.BlockSpec((kh * kw, c_in), lambda b, h: (0, 0)),
                pl.BlockSpec((c_in, c_out), lambda b, h: (0, 0)),
                pl.BlockSpec((1, c_out), lambda b, h: (0, 0)),
                pl.BlockSpec((1, c_out), lambda b, h: (0, 0)),
            ],
            out_specs=pl.BlockSpec((1, 1, w_out, c_out),
                                   lambda b, h: (b, h, 0, 0)),
        ),
        compiler_params=pltpu.CompilerParams(
            dimension_semantics=("parallel", "parallel")),
        cost_estimate=pl.CostEstimate(flops=flops, transcendentals=0,
                                      bytes_accessed=bytes_accessed),
    )(x_pad, wdw2, w_pw, scale, bias)

    # Back to NCHW.
    return jnp.transpose(out_nhwc, (0, 3, 1, 2))


if __name__ == "__main__":
    key = jax.random.PRNGKey(0)
    k1, k2, k3, k4, k5, k6, k7 = jax.random.split(key, 7)

    N, C_in, H, W = 2, 4, 16, 16
    C_out, K, STRIDE, PAD = 8, 3, 1, 1
    EPS = 1e-5

    x = jax.random.normal(k1, (N, C_in, H, W), dtype=jnp.float32)
    w_dw = jax.random.normal(k2, (K, K, C_in), dtype=jnp.float32) * 0.2
    w_pw = jax.random.normal(k3, (C_in, C_out), dtype=jnp.float32) * 0.2
    gamma = jax.random.uniform(k4, (C_out,), minval=0.5, maxval=1.5,
                               dtype=jnp.float32)
    beta = jax.random.normal(k5, (C_out,), dtype=jnp.float32) * 0.1
    running_mean = jax.random.normal(k6, (C_out,), dtype=jnp.float32) * 0.1
    running_var = jax.random.uniform(k7, (C_out,), minval=0.5, maxval=1.5,
                                     dtype=jnp.float32)

    y = sep_conv(x, w_dw, w_pw, gamma, beta, running_mean, running_var,
                 stride=STRIDE, padding=PAD, eps=EPS)
    jax.block_until_ready(y)

    # Pure-JAX reference (eval-mode BatchNorm).
    x_nhwc = jnp.maximum(jnp.transpose(x, (0, 2, 3, 1)), 0.0)
    dw_ref = lax.conv_general_dilated(
        x_nhwc, w_dw.reshape(K, K, 1, C_in),
        window_strides=(STRIDE, STRIDE),
        padding=((PAD, PAD), (PAD, PAD)),
        dimension_numbers=("NHWC", "HWIO", "NHWC"),
        feature_group_count=C_in,
        precision=lax.Precision.HIGHEST)
    pw_ref = jnp.einsum("nhwc,co->nhwo", dw_ref, w_pw,
                        precision=lax.Precision.HIGHEST)
    inv_std = gamma / jnp.sqrt(running_var + EPS)
    ref = pw_ref * inv_std + (beta - running_mean * inv_std)
    ref = jnp.transpose(ref, (0, 3, 1, 2))

    assert y.shape == (N, C_out, H, W) and y.dtype == x.dtype
    max_err = float(jnp.max(jnp.abs(y - ref)))
    assert jnp.allclose(y, ref, atol=1e-3, rtol=1e-3), f"max_err={max_err}"
    print("KERNEL_OK")
</pallas_src>

<mosaic_0001>
module attributes {stable_mosaic.version = 11 : i64} {
  func.func @_sepconv_row_kernel(%arg0: i32, %arg1: i32, %arg2: memref<1x18x18x4xf32, #tpu.memory_space<vmem>>, %arg3: memref<9x4xf32, #tpu.memory_space<vmem>>, %arg4: memref<4x8xf32, #tpu.memory_space<vmem>>, %arg5: memref<1x8xf32, #tpu.memory_space<vmem>>, %arg6: memref<1x8xf32, #tpu.memory_space<vmem>>, %arg7: memref<1x1x16x8xf32, #tpu.memory_space<vmem>>) attributes {dimension_semantics = [#tpu.dimension_semantics<parallel>, #tpu.dimension_semantics<parallel>], iteration_bounds = array<i64: 2, 16>, scalar_prefetch = 0 : i64, scratch_operands = 0 : i64, tpu.core_type = #tpu.core_type<tc>, window_params = [{transform_indices = @transform_0, window_bounds = array<i64: 1, 18, 18, 4>}, {pipeline_mode = #tpu.pipeline_mode<synchronous>, transform_indices = @transform_1, window_bounds = array<i64: 9, 4>}, {pipeline_mode = #tpu.pipeline_mode<synchronous>, transform_indices = @transform_2, window_bounds = array<i64: 4, 8>}, {pipeline_mode = #tpu.pipeline_mode<synchronous>, transform_indices = @transform_3, window_bounds = array<i64: 1, 8>}, {pipeline_mode = #tpu.pipeline_mode<synchronous>, transform_indices = @transform_4, window_bounds = array<i64: 1, 8>}, {transform_indices = @transform_5, window_bounds = array<i64: 1, 1, 16, 8>}]} {
    %c1_i32 = arith.constant 1 : i32
    %0 = arith.muli %arg1, %c1_i32 : i32
    %c0 = arith.constant 0 : index
    %1 = arith.index_cast %0 : i32 to index
    %c0_0 = arith.constant 0 : index
    %c0_1 = arith.constant 0 : index
    %2 = vector.load %arg2[%c0, %1, %c0_0, %c0_1] : memref<1x18x18x4xf32, #tpu.memory_space<vmem>>, vector<1x3x18x4xf32>
    %3 = vector.shape_cast %2 : vector<1x3x18x4xf32> to vector<3x18x4xf32>
    %cst = arith.constant 0.000000e+00 : f32
    %4 = vector.broadcast %cst : f32 to vector<3x18x4xf32>
    %5 = arith.maximumf %3, %4 : vector<3x18x4xf32>
    %c0_2 = arith.constant 0 : index
    %c0_3 = arith.constant 0 : index
    %6 = vector.load %arg3[%c0_2, %c0_3] : memref<9x4xf32, #tpu.memory_space<vmem>>, vector<9x4xf32>
    %cst_4 = arith.constant 0.000000e+00 : f32
    %7 = vector.broadcast %cst_4 : f32 to vector<16x4xf32>
    %8 = vector.extract_strided_slice %5 {offsets = [0, 0, 0], sizes = [1, 18, 4], strides = [1, 1, 1]} : vector<3x18x4xf32> to vector<1x18x4xf32>
    %9 = vector.shape_cast %8 : vector<1x18x4xf32> to vector<18x4xf32>
    %10 = vector.extract_strided_slice %9 {offsets = [0, 0], sizes = [16, 4], strides = [1, 1]} : vector<18x4xf32> to vector<16x4xf32>
    %11 = vector.extract_strided_slice %6 {offsets = [0, 0], sizes = [1, 4], strides = [1, 1]} : vector<9x4xf32> to vector<1x4xf32>
    %12 = vector.shape_cast %11 : vector<1x4xf32> to vector<4xf32>
    %13 = vector.shape_cast %12 : vector<4xf32> to vector<1x4xf32>
    %14 = vector.broadcast %13 : vector<1x4xf32> to vector<16x4xf32>
    %15 = arith.mulf %10, %14 : vector<16x4xf32>
    %16 = arith.addf %7, %15 : vector<16x4xf32>
    %17 = vector.extract_strided_slice %9 {offsets = [1, 0], sizes = [16, 4], strides = [1, 1]} : vector<18x4xf32> to vector<16x4xf32>
    %18 = vector.extract_strided_slice %6 {offsets = [1, 0], sizes = [1, 4], strides = [1, 1]} : vector<9x4xf32> to vector<1x4xf32>
    %19 = vector.shape_cast %18 : vector<1x4xf32> to vector<4xf32>
    %20 = vector.shape_cast %19 : vector<4xf32> to vector<1x4xf32>
    %21 = vector.broadcast %20 : vector<1x4xf32> to vector<16x4xf32>
    %22 = arith.mulf %17, %21 : vector<16x4xf32>
    %23 = arith.addf %16, %22 : vector<16x4xf32>
    %24 = vector.extract_strided_slice %9 {offsets = [2, 0], sizes = [16, 4], strides = [1, 1]} : vector<18x4xf32> to vector<16x4xf32>
    %25 = vector.extract_strided_slice %6 {offsets = [2, 0], sizes = [1, 4], strides = [1, 1]} : vector<9x4xf32> to vector<1x4xf32>
    %26 = vector.shape_cast %25 : vector<1x4xf32> to vector<4xf32>
    %27 = vector.shape_cast %26 : vector<4xf32> to vector<1x4xf32>
    %28 = vector.broadcast %27 : vector<1x4xf32> to vector<16x4xf32>
    %29 = arith.mulf %24, %28 : vector<16x4xf32>
    %30 = arith.addf %23, %29 : vector<16x4xf32>
    %31 = vector.extract_strided_slice %5 {offsets = [1, 0, 0], sizes = [1, 18, 4], strides = [1, 1, 1]} : vector<3x18x4xf32> to vector<1x18x4xf32>
    %32 = vector.shape_cast %31 : vector<1x18x4xf32> to vector<18x4xf32>
    %33 = vector.extract_strided_slice %32 {offsets = [0, 0], sizes = [16, 4], strides = [1, 1]} : vector<18x4xf32> to vector<16x4xf32>
    %34 = vector.extract_strided_slice %6 {offsets = [3, 0], sizes = [1, 4], strides = [1, 1]} : vector<9x4xf32> to vector<1x4xf32>
    %35 = vector.shape_cast %34 : vector<1x4xf32> to vector<4xf32>
    %36 = vector.shape_cast %35 : vector<4xf32> to vector<1x4xf32>
    %37 = vector.broadcast %36 : vector<1x4xf32> to vector<16x4xf32>
    %38 = arith.mulf %33, %37 : vector<16x4xf32>
    %39 = arith.addf %30, %38 : vector<16x4xf32>
    %40 = vector.extract_strided_slice %32 {offsets = [1, 0], sizes = [16, 4], strides = [1, 1]} : vector<18x4xf32> to vector<16x4xf32>
    %41 = vector.extract_strided_slice %6 {offsets = [4, 0], sizes = [1, 4], strides = [1, 1]} : vector<9x4xf32> to vector<1x4xf32>
    %42 = vector.shape_cast %41 : vector<1x4xf32> to vector<4xf32>
    %43 = vector.shape_cast %42 : vector<4xf32> to vector<1x4xf32>
    %44 = vector.broadcast %43 : vector<1x4xf32> to vector<16x4xf32>
    %45 = arith.mulf %40, %44 : vector<16x4xf32>
    %46 = arith.addf %39, %45 : vector<16x4xf32>
    %47 = vector.extract_strided_slice %32 {offsets = [2, 0], sizes = [16, 4], strides = [1, 1]} : vector<18x4xf32> to vector<16x4xf32>
    %48 = vector.extract_strided_slice %6 {offsets = [5, 0], sizes = [1, 4], strides = [1, 1]} : vector<9x4xf32> to vector<1x4xf32>
    %49 = vector.shape_cast %48 : vector<1x4xf32> to vector<4xf32>
    %50 = vector.shape_cast %49 : vector<4xf32> to vector<1x4xf32>
    %51 = vector.broadcast %50 : vector<1x4xf32> to vector<16x4xf32>
    %52 = arith.mulf %47, %51 : vector<16x4xf32>
    %53 = arith.addf %46, %52 : vector<16x4xf32>
    %54 = vector.extract_strided_slice %5 {offsets = [2, 0, 0], sizes = [1, 18, 4], strides = [1, 1, 1]} : vector<3x18x4xf32> to vector<1x18x4xf32>
    %55 = vector.shape_cast %54 : vector<1x18x4xf32> to vector<18x4xf32>
    %56 = vector.extract_strided_slice %55 {offsets = [0, 0], sizes = [16, 4], strides = [1, 1]} : vector<18x4xf32> to vector<16x4xf32>
    %57 = vector.extract_strided_slice %6 {offsets = [6, 0], sizes = [1, 4], strides = [1, 1]} : vector<9x4xf32> to vector<1x4xf32>
    %58 = vector.shape_cast %57 : vector<1x4xf32> to vector<4xf32>
    %59 = vector.shape_cast %58 : vector<4xf32> to vector<1x4xf32>
    %60 = vector.broadcast %59 : vector<1x4xf32> to vector<16x4xf32>
    %61 = arith.mulf %56, %60 : vector<16x4xf32>
    %62 = arith.addf %53, %61 : vector<16x4xf32>
    %63 = vector.extract_strided_slice %55 {offsets = [1, 0], sizes = [16, 4], strides = [1, 1]} : vector<18x4xf32> to vector<16x4xf32>
    %64 = vector.extract_strided_slice %6 {offsets = [7, 0], sizes = [1, 4], strides = [1, 1]} : vector<9x4xf32> to vector<1x4xf32>
    %65 = vector.shape_cast %64 : vector<1x4xf32> to vector<4xf32>
    %66 = vector.shape_cast %65 : vector<4xf32> to vector<1x4xf32>
    %67 = vector.broadcast %66 : vector<1x4xf32> to vector<16x4xf32>
    %68 = arith.mulf %63, %67 : vector<16x4xf32>
    %69 = arith.addf %62, %68 : vector<16x4xf32>
    %70 = vector.extract_strided_slice %55 {offsets = [2, 0], sizes = [16, 4], strides = [1, 1]} : vector<18x4xf32> to vector<16x4xf32>
    %71 = vector.extract_strided_slice %6 {offsets = [8, 0], sizes = [1, 4], strides = [1, 1]} : vector<9x4xf32> to vector<1x4xf32>
    %72 = vector.shape_cast %71 : vector<1x4xf32> to vector<4xf32>
    %73 = vector.shape_cast %72 : vector<4xf32> to vector<1x4xf32>
    %74 = vector.broadcast %73 : vector<1x4xf32> to vector<16x4xf32>
    %75 = arith.mulf %70, %74 : vector<16x4xf32>
    %76 = arith.addf %69, %75 : vector<16x4xf32>
    %c0_5 = arith.constant 0 : index
    %c0_6 = arith.constant 0 : index
    %77 = vector.load %arg4[%c0_5, %c0_6] : memref<4x8xf32, #tpu.memory_space<vmem>>, vector<4x8xf32>
    %cst_7 = arith.constant dense<0.000000e+00> : vector<16x8xf32>
    %78 = tpu.matmul %76, %77, %cst_7 {dimension_numbers = #tpu.dot_dimension_numbers<[1], [0], [0], [1], [0, 0, 1, 1], [], []>} : vector<16x4xf32>, vector<4x8xf32>, vector<16x8xf32> -> vector<16x8xf32>
    %c0_8 = arith.constant 0 : index
    %c0_9 = arith.constant 0 : index
    %79 = vector.load %arg5[%c0_8, %c0_9] : memref<1x8xf32, #tpu.memory_space<vmem>>, vector<1x8xf32>
    %80 = vector.broadcast %79 : vector<1x8xf32> to vector<16x8xf32>
    %81 = arith.mulf %78, %80 : vector<16x8xf32>
    %c0_10 = arith.constant 0 : index
    %c0_11 = arith.constant 0 : index
    %82 = vector.load %arg6[%c0_10, %c0_11] : memref<1x8xf32, #tpu.memory_space<vmem>>, vector<1x8xf32>
    %83 = vector.broadcast %82 : vector<1x8xf32> to vector<16x8xf32>
    %84 = arith.addf %81, %83 : vector<16x8xf32>
    %c0_12 = arith.constant 0 : index
    %c0_13 = arith.constant 0 : index
    %c0_14 = arith.constant 0 : index
    %c0_15 = arith.constant 0 : index
    %85 = vector.load %arg7[%c0_12, %c0_13, %c0_14, %c0_15] : memref<1x1x16x8xf32, #tpu.memory_space<vmem>>, vector<1x1x16x8xf32>
    %86 = vector.shape_cast %85 : vector<1x1x16x8xf32> to vector<16x8xf32>
    %87 = vector.shape_cast %84 : vector<16x8xf32> to vector<1x1x16x8xf32>
    tpu.vector_store %arg7[%c0_12, %c0_13, %c0_14, %c0_15], %87 {strides = array<i32>} : memref<1x1x16x8xf32, #tpu.memory_space<vmem>>, vector<1x1x16x8xf32>,
    return
  }
  func.func @transform_0(%arg0: i32, %arg1: i32) -> (i32, i32, i32, i32) {
    %c0_i32 = arith.constant 0 : i32
    %c0_i32_0 = arith.constant 0 : i32
    %c0_i32_1 = arith.constant 0 : i32
    %c0_i32_2 = arith.constant 0 : i32
    return %arg0, %c0_i32, %c0_i32_0, %c0_i32_1 : i32, i32, i32, i32
  }
  func.func @transform_1(%arg0: i32, %arg1: i32) -> (i32, i32) {
    %c0_i32 = arith.constant 0 : i32
    %c0_i32_0 = arith.constant 0 : i32
    %c0_i32_1 = arith.constant 0 : i32
    return %c0_i32, %c0_i32_0 : i32, i32
  }
  func.func @transform_2(%arg0: i32, %arg1: i32) -> (i32, i32) {
    %c0_i32 = arith.constant 0 : i32
    %c0_i32_0 = arith.constant 0 : i32
    %c0_i32_1 = arith.constant 0 : i32
    return %c0_i32, %c0_i32_0 : i32, i32
  }
  func.func @transform_3(%arg0: i32, %arg1: i32) -> (i32, i32) {
    %c0_i32 = arith.constant 0 : i32
    %c0_i32_0 = arith.constant 0 : i32
    %c0_i32_1 = arith.constant 0 : i32
    return %c0_i32, %c0_i32_0 : i32, i32
  }
  func.func @transform_4(%arg0: i32, %arg1: i32) -> (i32, i32) {
    %c0_i32 = arith.constant 0 : i32
    %c0_i32_0 = arith.constant 0 : i32
    %c0_i32_1 = arith.constant 0 : i32
    return %c0_i32, %c0_i32_0 : i32, i32
  }
  func.func @transform_5(%arg0: i32, %arg1: i32) -> (i32, i32, i32, i32) {
    %c0_i32 = arith.constant 0 : i32
    %c0_i32_0 = arith.constant 0 : i32
    %c0_i32_1 = arith.constant 0 : i32
    return %arg0, %arg1, %c0_i32, %c0_i32_0 : i32, i32, i32, i32
  }
}

</mosaic_0001>

<bundles_post_ra>
// kernel: tpu_custom_call.1
= control target key start
LH: loop header
LB: loop body
LE: loop exit
PB: predicated region body
PF: predicated region fallthrough
CT: control target
= control target key end

     0   :  { %s741_s18 = smov 0   ;;  %s743_s19 = smov 0   ;;  %s844_s0 = inlined_call_operand.vmem [shape: f32[2,18,18,4], index: 0, kind: input, shape index: {}]   ;;  %s845_s1 = inlined_call_operand.vmem [shape: f32[9,4], index: 1, kind: input, shape index: {}]   ;;  %s846_s2 = inlined_call_operand.vmem [shape: f32[4,8], index: 2, kind: input, shape index: {}]   ;;  %s847_s3 = inlined_call_operand.vmem [shape: f32[1,8], index: 3, kind: input, shape index: {}]   ;;  %s848_s4 = inlined_call_operand.vmem [shape: f32[1,8], index: 4, kind: input, shape index: {}]   ;;  %s849_s5 = inlined_call_operand.vmem [shape: f32[2,16,16,8], index: 5, kind: output, shape index: {}]  }
   0x1   :  { %s745_s20 = smov 0   ;;  %s747_s21 = smov 0  }
   0x2   :  { %s749_s22 = smov 0  }
   0x3 LB: > { %s24_s23 = sadd.s32 1, %s701_s20  ;;  %s27_s24 = sadd.s32 1, %s705_s21  ;;  %s709_s22 = sphi %s749_s22, %s15_s22   ;;  %s705_s21 = sphi %s747_s21, %s853_s21   ;;  %s701_s20 = sphi %s745_s20, %s852_s20   ;;  %s697_s19 = sphi %s743_s19, %s851_s19   ;;  %s693_s18 = sphi %s741_s18, %s850_s18  }
   0x4   : > { %p25_p0 = scmp.ge.s32.totalorder %s24_s23, 16  ;;  %p609_p1 = scmp.ge.s32.totalorder %s709_s22, 1 }
   0x5   : > { %p201_p2 = scmp.lt.s32.totalorder %s709_s22, 33 }
   0x6   : > { %s855_s23 = smov (%p25_p0, %s24_s23), 0  ;;  %s857_s24 = smov (!%p25_p0, %s27_s24), %s705_s21 }
   0x7   : > { %p202_p3 = pnand %p609_p1, %p201_p2  ;;  %p29_p4 = scmp.ge.s32.totalorder %s857_s24, 2 }
   0x8   : > { %v409_v0 = vld [vmem:[%s846_s2] sm:$0xf] (!%p202_p3)  ;;  %vm417_vm0 = vcmask (!%p202_p3), 1043456   ;;  %p233_p5 = scmp.lt.s32.totalorder (!%p202_p3), %s697_s19, 1  ;;  %v269_v1 = vlaneseq (!%p202_p3)  ;;  %s247_s27 = smul.u32 (!%p202_p3), 24, %s693_s18  ;;  %vm287_vm1 = vcmask (!%p202_p3), 1046528  }
   0x9   : > { %s859_s24 = smov (%p29_p4, %s857_s24), 0  ;;  %205 = sbr.rel (%p202_p3) target bundleno = 271 (0x10f), region = 40 }
   0xa   : > { %625 = vmatprep.subr.msk.mxu0 (!%p202_p3), %vm417_vm0, %v409_v0  ;;  %v270_v2 = vshrl.u32 (!%p202_p3), %v269_v1, 7  ;;  %v267_v3 = vld [vmem:[%s845_s1] sm:$0xff] (!%p202_p3)  ;;  %vm307_vm2 = vcmask (!%p202_p3), 1045504   ;;  %v614_v50 = vld [vmem:[%s845_s1 + $0x8] ss:$0 sm:$0xff] (!%p202_p3)  ;;  %vm410_vm3 = vcmask (!%p202_p3), 31744  }
   0xb   : > { %626 = vmatpush3.msk.msra.mxu0 (!%p202_p3), %vm417_vm0, %v409_v0  ;;  %p240_p6 = scmp.lt.s32.totalorder (!%p202_p3), %s693_s18, 15  ;;  %vm514_vm4 = vcmask (!%p202_p3), 64512  }
   0xc   : > { %v271_v4 = vsub.s32 (!%p202_p3), 0, %v270_v2  ;;  %v279_v5 = vsub.s32 (!%p202_p3), 1, %v270_v2  ;;  %v299_v6 = vsub.s32 (!%p202_p3), 2, %v270_v2  ;;  %v327_v7 = vsub.s32 (!%p202_p3), 4, %v270_v2 }
   0xd   : > { %v346_v8 = vsub.s32 (!%p202_p3), 5, %v270_v2  ;;  %v319_v10 = vsub.s32 (!%p202_p3), 3, %v270_v2  ;;  %v373_v11 = vsub.s32 (!%p202_p3), 7, %v270_v2  ;;  %v365_v26 = vsub.s32 (!%p202_p3), 6, %v270_v2 }
   0xe   : > { %v280_v9 = vrot.slane (!%p202_p3), %v267_v3, %v279_v5  ;;  %v272_v15 = vrot.slane (!%p202_p3), %v267_v3, %v271_v4  ;;  %v300_v16 = vrot.slane (!%p202_p3), %v267_v3, %v299_v6  ;;  %v328_v23 = vrot.slane (!%p202_p3), %v267_v3, %v327_v7 }
   0xf   : > { %v347_v25 = vrot.slane (!%p202_p3), %v267_v3, %v346_v8  ;;  %v320_v29 = vrot.slane (!%p202_p3), %v267_v3, %v319_v10  ;;  %v374_v30 = vrot.slane (!%p202_p3), %v267_v3, %v373_v11  ;;  %v366_v53 = vrot.slane (!%p202_p3), %v267_v3, %v365_v26 }
  0x10   : > { %s861_s19 = smov (!%p233_p5, %s697_s19), 1  ;;  %s863_s18 = smov (!%p240_p6, %s693_s18), 15 }
  0x11   : > { %s630_s28 = smul.u32 432, %s861_s19  ;;  %s611_s12 = sshll.u32 %s863_s18, 1 }
  0x12   : > { %s612_s13 = sshll.u32 %s861_s19, 5 }
  0x13   : > { %s237_s8 = scalar_lea.vmem %s844_s0, %s630_s28  ;;  %s244_s14 = sadd.s32 %s612_s13, %s611_s12 }
  0x14   : > { %s786_s9 = scalar_lea.vmem %s237_s8, %s247_s27  ;;  %s613_s17 = sshll.u32 %s244_s14, 3 }
  0x15   : > { %v249_v12 = vld [vmem:[%s786_s9] sm:$0xff]  ;;  %v250_v13 = vld [vmem:[%s786_s9 + $0x8] sm:$0xff]  ;;  %v252_v14 = vld [vmem:[%s786_s9 + $0x18] sm:$0xff]  ;;  %s246_s29 = scalar_lea.vmem %s849_s5, %s613_s17 }
  0x16   : > { %v253_v17 = vld [vmem:[%s786_s9 + $0x20] sm:$0xff]  ;;  %v255_v18 = vld [vmem:[%s786_s9 + $0x30] sm:$0xff]  ;;  %v256_v19 = vld [vmem:[%s786_s9 + $0x38] sm:$0xff]  ;;  %v258_v20 = vmax.f32 %v249_v12, 0.0  ;;  %v259_v21 = vmax.f32 %v250_v13, 0.0  ;;  %v261_v22 = vmax.f32 %v252_v14, 0.0 }
  0x17   : > { %v262_v24 = vmax.f32 %v253_v17, 0.0  ;;  %v264_v27 = vmax.f32 %v255_v18, 0.0  ;;  %v794_v31 = vmax.f32 %v256_v19, 0.0  ;;  %v257_v44 = vld [vmem:[%s786_s9 + $0x40] sm:$0x3] }
  0x18   : > { %v281_v28 = vmul.f32 %v280_v9, %v258_v20  ;;  %v282_v32 = vmul.f32 %v280_v9, %v259_v21  ;;  %v301_v33 = vmul.f32 %v300_v16, %v258_v20  ;;  %v302_v34 = vmul.f32 %v300_v16, %v259_v21  ;;  %v251_v49 = vld [vmem:[%s786_s9 + $0x10] sm:$0x3]  ;;  %v254_v58 = vld [vmem:[%s786_s9 + $0x28] sm:$0x3] }
  0x19   : > { %v273_v35 = vmul.f32 %v272_v15, %v258_v20  ;;  %v329_v37 = vmul.f32 %v328_v23, %v261_v22  ;;  %v330_v38 = vmul.f32 %v328_v23, %v262_v24  ;;  %v348_v42 = vmul.f32 %v347_v25, %v261_v22 }
  0x1a   : > { %v288_v36 = vrot.slane %v281_v28, 1  ;;  %v289_v39 = vrot.slane %v282_v32, 1  ;;  %v308_v40 = vrot.slane %v301_v33, 2  ;;  %v309_v41 = vrot.slane %v302_v34, 2 }
  0x1b   : > { %v349_v43 = vmul.f32 %v347_v25, %v262_v24  ;;  %v335_v47 = vrot.slane %v329_v37, 1  ;;  %v336_v48 = vrot.slane %v330_v38, 1  ;;  %v321_v52 = vmul.f32 %v320_v29, %v261_v22 }
  0x1c   : > { %v290_v45 = vsel %vm287_vm1, %v288_v36, %v289_v39  ;;  %v310_v46 = vsel %vm307_vm2, %v308_v40, %v309_v41  ;;  %v354_v54 = vrot.slane %v348_v42, 2  ;;  %v375_v56 = vmul.f32 %v374_v30, %v264_v27 }
  0x1d   : > { %v295_v51 = vadd.f32 %v290_v45, %v273_v35  ;;  %v355_v55 = vrot.slane %v349_v43, 2  ;;  %v376_v57 = vmul.f32 %v374_v30, %v794_v31  ;;  %v266_v59 = vmax.f32 %v257_v44, 0.0 }
  0x1e   : > { %v260_v61 = vmax.f32 %v251_v49, 0.0  ;;  %v274_v62 = vmul.f32 %v272_v15, %v259_v21  ;;  %v337_v63 = vsel %vm287_vm1, %v335_v47, %v336_v48  ;;  %v394_v0 = vmul.f32 %v614_v50, %v264_v27  ;;  %v619_v47 = vld [vmem:[%s848_s4] ss:$0 sm:$0xff] }
  0x1f   : > { %v315_v60 = vadd.f32 %v310_v46, %v295_v51  ;;  %v395_v1 = vmul.f32 %v614_v50, %v794_v31  ;;  %v263_v4 = vmax.f32 %v254_v58, 0.0  ;;  %v356_v3 = vsel %vm307_vm2, %v354_v54, %v355_v55 }
  0x20   : > { %v283_v5 = vmul.f32 %v280_v9, %v260_v61  ;;  %v303_v6 = vmul.f32 %v300_v16, %v260_v61  ;;  %v367_v7 = vmul.f32 %v366_v53, %v264_v27  ;;  %v381_v8 = vrot.slane %v375_v56, 1 }
  0x21   : > { %v323_v2 = vadd.f32 %v321_v52, %v315_v60  ;;  %v382_v10 = vrot.slane %v376_v57, 1  ;;  %v331_v14 = vmul.f32 %v328_v23, %v263_v4  ;;  %v400_v17 = vrot.slane %v394_v0, 2 }
  0x22   : > { %v291_v12 = vrot.slane %v283_v5, 1  ;;  %v311_v13 = vrot.slane %v303_v6, 2  ;;  %v401_v15 = vrot.slane %v395_v1, 2  ;;  %v350_v18 = vmul.f32 %v347_v25, %v263_v4 }
  0x23   : > { %v342_v11 = vadd.f32 %v337_v63, %v323_v2  ;;  %v338_v22 = vrot.slane %v331_v14, 1  ;;  %v322_v9 = vmul.f32 %v320_v29, %v262_v24  ;;  %v383_v16 = vsel %vm287_vm1, %v381_v8, %v382_v10 }
  0x24   : > { %v292_v20 = vsel %vm287_vm1, %v289_v39, %v291_v12  ;;  %v312_v21 = vsel %vm307_vm2, %v309_v41, %v311_v13  ;;  %v357_v28 = vrot.slane %v350_v18, 2  ;;  %v377_v32 = vmul.f32 %v374_v30, %v266_v59 }
  0x25   : > { %v361_v19 = vadd.f32 %v356_v3, %v342_v11  ;;  %v296_v26 = vadd.f32 %v292_v20, %v274_v62  ;;  %v402_v33 = vsel %vm307_vm2, %v400_v17, %v401_v15  ;;  %v396_v35 = vmul.f32 %v614_v50, %v266_v59 }
  0x26   : > { %v339_v25 = vsel %vm287_vm1, %v336_v48, %v338_v22  ;;  %v358_v24 = vsel %vm307_vm2, %v355_v55, %v357_v28  ;;  %v384_v29 = vrot.slane %v377_v32, 1  ;;  %v368_v38 = vmul.f32 %v366_v53, %v794_v31  ;;  %v618_v31 = vld [vmem:[%s847_s3] ss:$0 sm:$0xff] }
  0x27   : > { %v369_v27 = vadd.f32 %v367_v7, %v361_v19  ;;  %v316_v34 = vadd.f32 %v312_v21, %v296_v26  ;;  %v403_v30 = vrot.slane %v396_v35, 2 }
  0x28   : > { %v385_v41 = vsel %vm287_vm1, %v382_v10, %v384_v29 }
  0x29   : > { %v388_v23 = vadd.f32 %v383_v16, %v369_v27  ;;  %v324_v36 = vadd.f32 %v322_v9, %v316_v34  ;;  %v404_v43 = vsel %vm307_vm2, %v401_v15, %v403_v30 }
  0x2b   : > { %v407_v37 = vadd.f32 %v402_v33, %v388_v23  ;;  %v343_v39 = vadd.f32 %v339_v25, %v324_v36 }
  0x2d   : > { %627 = vmatprep.mubr.msk.f32.mxu0 %vm410_vm3, %v407_v37  ;;  %v362_v40 = vadd.f32 %v358_v24, %v343_v39 }
  0x2f   : > { %v370_v42 = vadd.f32 %v368_v38, %v362_v40 }
  0x31   : > { %v389_v44 = vadd.f32 %v385_v41, %v370_v42 }
  0x33   : > { %v408_v45 = vadd.f32 %v404_v43, %v389_v44 }
  0x35   : > { %628 = vmatmul.mubr.msk.f32.vlgmr.msra.gmra.mrb[0].mxu0 %vm410_vm3, %v408_v45 }
 0x108   : > { %v629_v46 = vpop.f32.mrb[0].mxu0 }
 0x109   : > { %v504_v48 = vmul.f32 %v629_v46, %v618_v31  ;;  %v487_v49 = vpop.f32.mrb[1].mxu0 }
 0x10a   : > { %v503_v50 = vmul.f32 %v618_v31, %v487_v49 }
 0x10b   : > { %v513_v51 = vadd.f32 %v619_v47, %v504_v48 }
 0x10c   : > { %v512_v52 = vadd.f32 %v619_v47, %v503_v50 }
 0x10d   : > { %516 = vst.msk [vmem:[%s246_s29 + $0x8] sm:$0xff] %vm514_vm4, %v513_v51 }
 0x10e   : > { %515 = vst.msk [vmem:[%s246_s29] sm:$0xff] %vm514_vm4, %v512_v52 }
 0x10f PF: > { %s15_s22 = sadd.s32 1, %s709_s22   ;;  %s850_s18 = smov %s701_s20 }
 0x110   : > { %p12_p7 = scmp.ge.s32.totalorder %s15_s22, 34   ;;  %s851_s19 = smov %s705_s21 }
 0x111   : > { %s852_s20 = smov %s855_s23  ;;  %s853_s21 = smov %s859_s24 }
 0x112   :  { %14 = sbr.rel (!%p12_p7) target bundleno = 3 (0x3), region = 71 }

</bundles_post_ra>
